<compile_context>
chip_gen: v7x
topology: tpu7x:2x2x1
jax: 0.10.0
libtpu: 0.0.40
codegen_flags: <defaults>
</compile_context>

<pallas_src>
import numpy as np
import jax
import jax.numpy as jnp
from jax import lax
from jax.experimental import pallas as pl
from jax.experimental.pallas import tpu as pltpu

WORDLE_N = 5
WORD_WIDTH = 26 * WORDLE_N  # 130


def _round_up(n, m):
    return ((n + m - 1) // m) * m


def _pad2d(a, rows, cols):
    pr = rows - a.shape[0]
    pc = cols - a.shape[1]
    if pr == 0 and pc == 0:
        return a
    return jnp.pad(a, ((0, pr), (0, pc)))


def _make_kernel(n_words):
    def kernel(x_ref, w0_ref, b0_ref, w1_ref, b1_ref, w2_ref, b2_ref,
               wz_ref, bz_ref, out_ref):
        # MLP trunk (f0): Linear+ReLU, Linear+ReLU, Linear+ReLU (n_hidden = 1).
        x = x_ref[...]
        h = jnp.maximum(
            jnp.dot(x, w0_ref[...], preferred_element_type=jnp.float32)
            + b0_ref[...], 0.0)
        h = jnp.maximum(
            jnp.dot(h, w1_ref[...], preferred_element_type=jnp.float32)
            + b1_ref[...], 0.0)
        y = jnp.maximum(
            jnp.dot(h, w2_ref[...], preferred_element_type=jnp.float32)
            + b2_ref[...], 0.0)

        # Single fused head matmul:
        #   columns [0, n_words)      -> folded actor logits (actor_head @ words)
        #   column  n_words           -> critic
        #   columns > n_words         -> zero padding (keeps the store lane-dense)
        z = (jnp.dot(y, wz_ref[...], preferred_element_type=jnp.float32)
             + bz_ref[...])

        col = lax.broadcasted_iota(jnp.int32, z.shape, 1)
        is_logit = col < n_words

        # log_softmax over the real n_words columns only, then clamp(-15, 0).
        masked = jnp.where(is_logit, z, -jnp.inf)
        m = jnp.max(masked, axis=-1, keepdims=True)
        lse = jnp.log(jnp.sum(jnp.exp(masked - m), axis=-1, keepdims=True)) + m
        actor = jnp.clip(z - lse, -15.0, 0.0)

        # Actor values in logit columns, raw critic (and harmless padding)
        # elsewhere. Wrapper slices the real columns back out.
        out_ref[...] = jnp.where(is_logit, actor, z)

    return kernel


def sumchars_forward(x, params, words, *, batch_tile=None):
    B, obs_size = x.shape
    hidden = params["w0"].shape[1]
    word_width = params["w2"].shape[1]
    n_words = words.shape[1]

    if batch_tile is None:
        batch_tile = B if B <= 256 else 256
    assert B % batch_tile == 0 and batch_tile % 8 == 0

    obs_pad = _round_up(obs_size, 128)
    hid_pad = _round_up(hidden, 128)
    ww_pad = _round_up(word_width, 128)
    n_pad = _round_up(n_words + 1, 128)   # actor logits + critic column

    f32 = jnp.float32
    x_p = _pad2d(x.astype(f32), B, obs_pad)
    w0 = _pad2d(params["w0"].astype(f32), obs_pad, hid_pad)
    b0 = _pad2d(params["b0"].astype(f32), 1, hid_pad)
    w1 = _pad2d(params["w1"].astype(f32), hid_pad, hid_pad)
    b1 = _pad2d(params["b1"].astype(f32), 1, hid_pad)
    w2 = _pad2d(params["w2"].astype(f32), hid_pad, ww_pad)
    b2 = _pad2d(params["b2"].astype(f32), 1, ww_pad)

    # Fold actor_head into the constant word matrix (exact: composition of
    # linear maps) and append the critic head as one extra column.
    w_logits = params["wa"].astype(f32) @ words.astype(f32)    # (word_width, n_words)
    b_logits = params["ba"].astype(f32) @ words.astype(f32)    # (1, n_words)
    w_comb = jnp.concatenate([w_logits, params["wc"].astype(f32)], axis=1)
    b_comb = jnp.concatenate([b_logits, params["bc"].astype(f32)], axis=1)
    wz = _pad2d(w_comb, ww_pad, n_pad)
    bz = _pad2d(b_comb, 1, n_pad)

    grid = (B // batch_tile,)

    def batch_map(i):
        return (i, 0)

    def full_map(i):
        return (0, 0)

    in_specs = [
        pl.BlockSpec((batch_tile, obs_pad), batch_map),   # x
        pl.BlockSpec(w0.shape, full_map),                 # w0 (padded)
        pl.BlockSpec(b0.shape, full_map),                 # b0
        pl.BlockSpec(w1.shape, full_map),                 # w1
        pl.BlockSpec(b1.shape, full_map),                 # b1
        pl.BlockSpec(w2.shape, full_map),                 # w2
        pl.BlockSpec(b2.shape, full_map),                 # b2
        pl.BlockSpec(wz.shape, full_map),                 # fused actor+critic W
        pl.BlockSpec(bz.shape, full_map),                 # fused actor+critic b
    ]
    out_specs = pl.BlockSpec((batch_tile, n_pad), batch_map)
    out_shape = jax.ShapeDtypeStruct((B, n_pad), f32)

    out = pl.pallas_call(
        _make_kernel(n_words),
        grid=grid,
        in_specs=in_specs,
        out_specs=out_specs,
        out_shape=out_shape,
        compiler_params=pltpu.CompilerParams(
            dimension_semantics=("parallel",)),
    )(x_p, w0, b0, w1, b1, w2, b2, wz, bz)

    actor = out[:, :n_words]
    critic = out[:, n_words:n_words + 1]
    return actor, critic


def build_word_array(word_list):
    """word_array[j*26 + (ord(c)-ord('A')), i] = 1 -- exactly as in the module."""
    word_array = np.zeros((WORD_WIDTH, len(word_list)), dtype=np.float32)
    for i, word in enumerate(word_list):
        for j, c in enumerate(word):
            word_array[j * 26 + (ord(c) - ord("A")), i] = 1.0
    return jnp.asarray(word_array)


def init_params(key, obs_size, hidden_size):
    """Deterministic synthetic parameters. Weights are (in, out)."""
    ks = jax.random.split(key, 10)

    def lin(kw, kb, fan_in, fan_out):
        scale = 1.0 / np.sqrt(fan_in)
        w = jax.random.uniform(kw, (fan_in, fan_out), jnp.float32, -scale, scale)
        b = jax.random.uniform(kb, (1, fan_out), jnp.float32, -scale, scale)
        return w, b

    w0, b0 = lin(ks[0], ks[1], obs_size, hidden_size)
    w1, b1 = lin(ks[2], ks[3], hidden_size, hidden_size)
    w2, b2 = lin(ks[4], ks[5], hidden_size, WORD_WIDTH)
    wa, ba = lin(ks[6], ks[7], WORD_WIDTH, WORD_WIDTH)
    wc, bc = lin(ks[8], ks[9], WORD_WIDTH, 1)
    return dict(w0=w0, b0=b0, w1=w1, b1=b1, w2=w2, b2=b2,
                wa=wa, ba=ba, wc=wc, bc=bc)


def reference_forward(x, params, words):
    x = x.astype(jnp.float32)
    h = jax.nn.relu(x @ params["w0"] + params["b0"])
    h = jax.nn.relu(h @ params["w1"] + params["b1"])
    y = jax.nn.relu(h @ params["w2"] + params["b2"])
    logits = (y @ params["wa"] + params["ba"]) @ words
    actor = jnp.clip(jax.nn.log_softmax(logits, axis=-1), -15.0, 0.0)
    critic = y @ params["wc"] + params["bc"]
    return actor, critic


if __name__ == "__main__":
    # Small shapes consistent with the module's forward.
    batch = 16
    obs_size = 52
    hidden_size = 64
    word_list = ["APPLE", "BREAD", "CRANE", "DRINK", "EAGLE", "FLAME",
                 "GRAPE", "HOUSE", "IVORY", "JUICE", "KNIFE", "LEMON",
                 "MANGO", "NIGHT", "OCEAN", "PIANO"]

    key = jax.random.PRNGKey(0)
    kx, kp = jax.random.split(key)
    x = jax.random.normal(kx, (batch, obs_size), dtype=jnp.float32)
    params = init_params(kp, obs_size, hidden_size)
    words = build_word_array(word_list)

    actor, critic = sumchars_forward(x, params, words)
    jax.block_until_ready((actor, critic))

    ref_actor, ref_critic = reference_forward(x, params, words)
    # Tolerance covers the (exact-in-math, fp-reordered) actor-head fold.
    np.testing.assert_allclose(np.asarray(actor), np.asarray(ref_actor),
                               rtol=1e-4, atol=1e-4)
    np.testing.assert_allclose(np.asarray(critic), np.asarray(ref_critic),
                               rtol=1e-4, atol=1e-4)

    print("KERNEL_OK")
</pallas_src>

<mosaic_0001>
module attributes {stable_mosaic.version = 11 : i64} {
  func.func @kernel(%arg0: i32, %arg1: memref<16x128xf32, #tpu.memory_space<vmem>>, %arg2: memref<128x128xf32, #tpu.memory_space<vmem>>, %arg3: memref<1x128xf32, #tpu.memory_space<vmem>>, %arg4: memref<128x128xf32, #tpu.memory_space<vmem>>, %arg5: memref<1x128xf32, #tpu.memory_space<vmem>>, %arg6: memref<128x256xf32, #tpu.memory_space<vmem>>, %arg7: memref<1x256xf32, #tpu.memory_space<vmem>>, %arg8: memref<256x128xf32, #tpu.memory_space<vmem>>, %arg9: memref<1x128xf32, #tpu.memory_space<vmem>>, %arg10: memref<16x128xf32, #tpu.memory_space<vmem>>) attributes {dimension_semantics = [#tpu.dimension_semantics<parallel>], iteration_bounds = array<i64: 1>, scalar_prefetch = 0 : i64, scratch_operands = 0 : i64, tpu.core_type = #tpu.core_type<tc>, window_params = [{transform_indices = @transform_0, window_bounds = array<i64: 16, 128>}, {pipeline_mode = #tpu.pipeline_mode<synchronous>, transform_indices = @transform_1, window_bounds = array<i64: 128, 128>}, {pipeline_mode = #tpu.pipeline_mode<synchronous>, transform_indices = @transform_2, window_bounds = array<i64: 1, 128>}, {pipeline_mode = #tpu.pipeline_mode<synchronous>, transform_indices = @transform_3, window_bounds = array<i64: 128, 128>}, {pipeline_mode = #tpu.pipeline_mode<synchronous>, transform_indices = @transform_4, window_bounds = array<i64: 1, 128>}, {pipeline_mode = #tpu.pipeline_mode<synchronous>, transform_indices = @transform_5, window_bounds = array<i64: 128, 256>}, {pipeline_mode = #tpu.pipeline_mode<synchronous>, transform_indices = @transform_6, window_bounds = array<i64: 1, 256>}, {pipeline_mode = #tpu.pipeline_mode<synchronous>, transform_indices = @transform_7, window_bounds = array<i64: 256, 128>}, {pipeline_mode = #tpu.pipeline_mode<synchronous>, transform_indices = @transform_8, window_bounds = array<i64: 1, 128>}, {transform_indices = @transform_9, window_bounds = array<i64: 16, 128>}]} {
    %c0 = arith.constant 0 : index
    %c0_0 = arith.constant 0 : index
    %0 = vector.load %arg1[%c0, %c0_0] : memref<16x128xf32, #tpu.memory_space<vmem>>, vector<16x128xf32>
    %c0_1 = arith.constant 0 : index
    %c0_2 = arith.constant 0 : index
    %1 = vector.load %arg2[%c0_1, %c0_2] : memref<128x128xf32, #tpu.memory_space<vmem>>, vector<128x128xf32>
    %cst = arith.constant dense<0.000000e+00> : vector<16x128xf32>
    %2 = tpu.matmul %0, %1, %cst {dimension_numbers = #tpu.dot_dimension_numbers<[1], [0], [0], [1], [0, 0, 1, 1], [], []>} : vector<16x128xf32>, vector<128x128xf32>, vector<16x128xf32> -> vector<16x128xf32>
    %c0_3 = arith.constant 0 : index
    %c0_4 = arith.constant 0 : index
    %3 = vector.load %arg3[%c0_3, %c0_4] : memref<1x128xf32, #tpu.memory_space<vmem>>, vector<1x128xf32>
    %4 = vector.broadcast %3 : vector<1x128xf32> to vector<16x128xf32>
    %5 = arith.addf %2, %4 : vector<16x128xf32>
    %cst_5 = arith.constant 0.000000e+00 : f32
    %6 = vector.broadcast %cst_5 : f32 to vector<16x128xf32>
    %7 = arith.maximumf %5, %6 : vector<16x128xf32>
    %c0_6 = arith.constant 0 : index
    %c0_7 = arith.constant 0 : index
    %8 = vector.load %arg4[%c0_6, %c0_7] : memref<128x128xf32, #tpu.memory_space<vmem>>, vector<128x128xf32>
    %cst_8 = arith.constant dense<0.000000e+00> : vector<16x128xf32>
    %9 = tpu.matmul %7, %8, %cst_8 {dimension_numbers = #tpu.dot_dimension_numbers<[1], [0], [0], [1], [0, 0, 1, 1], [], []>} : vector<16x128xf32>, vector<128x128xf32>, vector<16x128xf32> -> vector<16x128xf32>
    %c0_9 = arith.constant 0 : index
    %c0_10 = arith.constant 0 : index
    %10 = vector.load %arg5[%c0_9, %c0_10] : memref<1x128xf32, #tpu.memory_space<vmem>>, vector<1x128xf32>
    %11 = vector.broadcast %10 : vector<1x128xf32> to vector<16x128xf32>
    %12 = arith.addf %9, %11 : vector<16x128xf32>
    %cst_11 = arith.constant 0.000000e+00 : f32
    %13 = vector.broadcast %cst_11 : f32 to vector<16x128xf32>
    %14 = arith.maximumf %12, %13 : vector<16x128xf32>
    %c0_12 = arith.constant 0 : index
    %c0_13 = arith.constant 0 : index
    %15 = vector.load %arg6[%c0_12, %c0_13] : memref<128x256xf32, #tpu.memory_space<vmem>>, vector<128x256xf32>
    %cst_14 = arith.constant dense<0.000000e+00> : vector<16x256xf32>
    %16 = tpu.matmul %14, %15, %cst_14 {dimension_numbers = #tpu.dot_dimension_numbers<[1], [0], [0], [1], [0, 0, 1, 1], [], []>} : vector<16x128xf32>, vector<128x256xf32>, vector<16x256xf32> -> vector<16x256xf32>
    %c0_15 = arith.constant 0 : index
    %c0_16 = arith.constant 0 : index
    %17 = vector.load %arg7[%c0_15, %c0_16] : memref<1x256xf32, #tpu.memory_space<vmem>>, vector<1x256xf32>
    %18 = vector.broadcast %17 : vector<1x256xf32> to vector<16x256xf32>
    %19 = arith.addf %16, %18 : vector<16x256xf32>
    %cst_17 = arith.constant 0.000000e+00 : f32
    %20 = vector.broadcast %cst_17 : f32 to vector<16x256xf32>
    %21 = arith.maximumf %19, %20 : vector<16x256xf32>
    %c0_18 = arith.constant 0 : index
    %c0_19 = arith.constant 0 : index
    %22 = vector.load %arg8[%c0_18, %c0_19] : memref<256x128xf32, #tpu.memory_space<vmem>>, vector<256x128xf32>
    %cst_20 = arith.constant dense<0.000000e+00> : vector<16x128xf32>
    %23 = tpu.matmul %21, %22, %cst_20 {dimension_numbers = #tpu.dot_dimension_numbers<[1], [0], [0], [1], [0, 0, 1, 1], [], []>} : vector<16x256xf32>, vector<256x128xf32>, vector<16x128xf32> -> vector<16x128xf32>
    %c0_21 = arith.constant 0 : index
    %c0_22 = arith.constant 0 : index
    %24 = vector.load %arg9[%c0_21, %c0_22] : memref<1x128xf32, #tpu.memory_space<vmem>>, vector<1x128xf32>
    %25 = vector.broadcast %24 : vector<1x128xf32> to vector<16x128xf32>
    %26 = arith.addf %23, %25 : vector<16x128xf32>
    %27 = tpu.iota {dimensions = array<i32: 1>} : vector<16x128xi32>
    %c16_i32 = arith.constant 16 : i32
    %28 = vector.broadcast %c16_i32 : i32 to vector<16x128xi32>
    %29 = arith.cmpi slt, %27, %28 : vector<16x128xi32>
    %cst_23 = arith.constant 0xFF800000 : f32
    %30 = vector.broadcast %cst_23 : f32 to vector<16x128xf32>
    %31 = arith.select %29, %26, %30 : vector<16x128xi1>, vector<16x128xf32>
    %cst_24 = arith.constant dense<0xFF800000> : vector<16xf32>
    %32 = vector.multi_reduction <maximumf>, %31, %cst_24 [1] : vector<16x128xf32> to vector<16xf32>
    %33 = vector.shape_cast %32 : vector<16xf32> to vector<16x1xf32>
    %34 = vector.broadcast %33 : vector<16x1xf32> to vector<16x128xf32>
    %35 = arith.subf %31, %34 : vector<16x128xf32>
    %36 = math.exp %35 : vector<16x128xf32>
    %cst_25 = arith.constant dense<0.000000e+00> : vector<16xf32>
    %37 = vector.multi_reduction <add>, %36, %cst_25 [1] : vector<16x128xf32> to vector<16xf32>
    %38 = vector.shape_cast %37 : vector<16xf32> to vector<16x1xf32>
    %39 = math.log %38 : vector<16x1xf32>
    %40 = arith.addf %39, %33 : vector<16x1xf32>
    %41 = vector.broadcast %40 : vector<16x1xf32> to vector<16x128xf32>
    %42 = arith.subf %26, %41 : vector<16x128xf32>
    %cst_26 = arith.constant -1.500000e+01 : f32
    %cst_27 = arith.constant 0.000000e+00 : f32
    %43 = vector.broadcast %cst_26 : f32 to vector<16x128xf32>
    %44 = arith.maximumf %43, %42 : vector<16x128xf32>
    %45 = vector.broadcast %cst_27 : f32 to vector<16x128xf32>
    %46 = arith.minimumf %45, %44 : vector<16x128xf32>
    %47 = arith.select %29, %46, %26 : vector<16x128xi1>, vector<16x128xf32>
    %c0_28 = arith.constant 0 : index
    %c0_29 = arith.constant 0 : index
    %48 = vector.load %arg10[%c0_28, %c0_29] : memref<16x128xf32, #tpu.memory_space<vmem>>, vector<16x128xf32>
    tpu.vector_store %arg10[%c0_28, %c0_29], %47 {strides = array<i32>} : memref<16x128xf32, #tpu.memory_space<vmem>>, vector<16x128xf32>,
    return
  }
  func.func @transform_0(%arg0: i32) -> (i32, i32) {
    %c0_i32 = arith.constant 0 : i32
    %c0_i32_0 = arith.constant 0 : i32
    return %arg0, %c0_i32 : i32, i32
  }
  func.func @transform_1(%arg0: i32) -> (i32, i32) {
    %c0_i32 = arith.constant 0 : i32
    %c0_i32_0 = arith.constant 0 : i32
    %c0_i32_1 = arith.constant 0 : i32
    return %c0_i32, %c0_i32_0 : i32, i32
  }
  func.func @transform_2(%arg0: i32) -> (i32, i32) {
    %c0_i32 = arith.constant 0 : i32
    %c0_i32_0 = arith.constant 0 : i32
    %c0_i32_1 = arith.constant 0 : i32
    return %c0_i32, %c0_i32_0 : i32, i32
  }
  func.func @transform_3(%arg0: i32) -> (i32, i32) {
    %c0_i32 = arith.constant 0 : i32
    %c0_i32_0 = arith.constant 0 : i32
    %c0_i32_1 = arith.constant 0 : i32
    return %c0_i32, %c0_i32_0 : i32, i32
  }
  func.func @transform_4(%arg0: i32) -> (i32, i32) {
    %c0_i32 = arith.constant 0 : i32
    %c0_i32_0 = arith.constant 0 : i32
    %c0_i32_1 = arith.constant 0 : i32
    return %c0_i32, %c0_i32_0 : i32, i32
  }
  func.func @transform_5(%arg0: i32) -> (i32, i32) {
    %c0_i32 = arith.constant 0 : i32
    %c0_i32_0 = arith.constant 0 : i32
    %c0_i32_1 = arith.constant 0 : i32
    return %c0_i32, %c0_i32_0 : i32, i32
  }
  func.func @transform_6(%arg0: i32) -> (i32, i32) {
    %c0_i32 = arith.constant 0 : i32
    %c0_i32_0 = arith.constant 0 : i32
    %c0_i32_1 = arith.constant 0 : i32
    return %c0_i32, %c0_i32_0 : i32, i32
  }
  func.func @transform_7(%arg0: i32) -> (i32, i32) {
    %c0_i32 = arith.constant 0 : i32
    %c0_i32_0 = arith.constant 0 : i32
    %c0_i32_1 = arith.constant 0 : i32
    return %c0_i32, %c0_i32_0 : i32, i32
  }
  func.func @transform_8(%arg0: i32) -> (i32, i32) {
    %c0_i32 = arith.constant 0 : i32
    %c0_i32_0 = arith.constant 0 : i32
    %c0_i32_1 = arith.constant 0 : i32
    return %c0_i32, %c0_i32_0 : i32, i32
  }
  func.func @transform_9(%arg0: i32) -> (i32, i32) {
    %c0_i32 = arith.constant 0 : i32
    %c0_i32_0 = arith.constant 0 : i32
    return %arg0, %c0_i32 : i32, i32
  }
}

</mosaic_0001>

<bundles_post_ra>
// kernel: tpu_custom_call.1
= control target key start
LH: loop header
LB: loop body
LE: loop exit
PB: predicated region body
PF: predicated region fallthrough
CT: control target
= control target key end

     0   :  { %14 = vsyncpa [#allocation3], 0  ;;  %s1208_s0 = inlined_call_operand.hbm [shape: f32[16,128], index: 0, kind: input, shape index: {}]   ;;  %s1209_s1 = inlined_call_operand.hbm [shape: f32[128,128], index: 1, kind: input, shape index: {}]   ;;  %s1210_s2 = inlined_call_operand.vmem [shape: f32[1,128], index: 2, kind: input, shape index: {}]   ;;  %s1211_s3 = inlined_call_operand.hbm [shape: f32[128,128], index: 3, kind: input, shape index: {}]   ;;  %s1212_s4 = inlined_call_operand.vmem [shape: f32[1,128], index: 4, kind: input, shape index: {}]   ;;  %s1213_s5 = inlined_call_operand.hbm [shape: f32[128,256], index: 5, kind: input, shape index: {}]   ;;  %s1214_s6 = inlined_call_operand.vmem [shape: f32[1,256], index: 6, kind: input, shape index: {}]   ;;  %s1215_s7 = inlined_call_operand.hbm [shape: f32[256,128], index: 7, kind: input, shape index: {}]   ;;  %s1216_s8 = inlined_call_operand.vmem [shape: f32[1,128], index: 8, kind: input, shape index: {}]   ;;  %s1217_s9 = inlined_call_operand.hbm [shape: f32[16,128], index: 9, kind: output, shape index: {}]  }
   0x1   :  { %15 = vsyncpa [#allocation6], 0 }
   0x2   :  { %16 = vsyncpa [#allocation9], 0 }
   0x3   :  { %17 = vsyncpa [#allocation4], 0  ;;  %s1030_s30 = smov [#allocation5]   ;;  %s1031_s11 = smov [#allocation8]  }
   0x4   :  { %s35_s10 = sshll.u32 %s1030_s30, 4  ;;  %s63_s12 = sshll.u32 %s1031_s11, 4  ;;  %s36_s10 = int_to_ptr.vmem [resolvable:$true] %s35_s10  ;;  %s1091_s12 = int_to_ptr.vmem [resolvable:$true] %s63_s12 }
   0x5   :  { %s890_s15 = scalar_lea.hbm %s1209_s1, 2048 }
   0x6   :  { %p891_p0 = scmp.ne.s32.totalorder %s1209_s1, %s890_s15  ;;  %p894_p1 = scmp.lt.u32.totalorder %s890_s15, %s1209_s1 }
   0x8   :  { %p896_p2 = pnand %p894_p1, %p891_p0 }
   0xa   :  { %899 = shalt.err (!%p896_p2)
}
   0xb   :  { %s900_s20 = scalar_lea.vmem %s36_s10, 2048  ;;  %p905_p4 = scmp.lt.s32.totalorder %s36_s10, %s36_s10 }
   0xc   :  { %p901_p3 = scmp.ne.s32.totalorder %s36_s10, %s900_s20  ;;  %p906_p5 = scmp.lt.s32.totalorder %s900_s20, %s900_s20 }
   0xe   :  { %p907_p6 = por %p906_p5, %p905_p4 }
  0x10   :  { %p908_p7 = pnand %p907_p6, %p901_p3 }
  0x12   :  { %911 = shalt.err (!%p908_p7)
}
  0x13   :  { %s1032_s21 = smov 128   ;;  %s1033_s22 = smov 8  }
  0x14   :  { %41 = dma.hbm_to_vmem [thread:$0]  %s1209_s1, 2048, %s36_s10, [#allocation6], %s1032_s21, %s1032_s21, %s1033_s22  }
  0x15   :  { %s912_s27 = scalar_lea.hbm %s1213_s5, 4096 }
  0x16   :  { %p913_p8 = scmp.ne.s32.totalorder %s1213_s5, %s912_s27  ;;  %p916_p9 = scmp.lt.u32.totalorder %s912_s27, %s1213_s5 }
  0x18   :  { %p918_p10 = pnand %p916_p9, %p913_p8 }
  0x1a   :  { %921 = shalt.err (!%p918_p10)
}
  0x1b   :  { %s922_s13 = scalar_lea.vmem %s1091_s12, 4096  ;;  %p927_p12 = scmp.lt.s32.totalorder %s1091_s12, %s1091_s12 }
  0x1c   :  { %p923_p11 = scmp.ne.s32.totalorder %s1091_s12, %s922_s13  ;;  %p928_p13 = scmp.lt.s32.totalorder %s922_s13, %s922_s13 }
  0x1e   :  { %p929_p0 = por %p928_p13, %p927_p12 }
  0x20   :  { %p930_p1 = pnand %p929_p0, %p923_p11 }
  0x22   :  { %933 = shalt.err (!%p930_p1)
}
  0x23   :  { %s1034_s1 = smov 256   ;;  %s1035_s10 = smov 16  }
  0x24   :  { %69 = dma.hbm_to_vmem [thread:$0]  %s1213_s5, 4096, %s1091_s12, [#allocation9], %s1034_s1, %s1034_s1, %s1035_s10  }
  0x25   :  { %s1036_s16 = smov [#allocation2]   ;;  %s1037_s18 = smov [#allocation7]  }
  0x26   :  { %s23_s17 = sshll.u32 %s1036_s16, 4  ;;  %s49_s19 = sshll.u32 %s1037_s18, 4  ;;  %s24_s17 = int_to_ptr.vmem [resolvable:$true] %s23_s17  ;;  %s1125_s19 = int_to_ptr.vmem [resolvable:$true] %s49_s19 }
  0x27   :  { %s934_s24 = scalar_lea.hbm %s1208_s0, 256 }
  0x28   :  { %p935_p2 = scmp.ne.s32.totalorder %s1208_s0, %s934_s24  ;;  %p938_p3 = scmp.lt.u32.totalorder %s934_s24, %s1208_s0 }
  0x2a   :  { %p940_p4 = pnand %p938_p3, %p935_p2 }
  0x2c   :  { %943 = shalt.err (!%p940_p4)
}
  0x2d   :  { %s944_s5 = scalar_lea.vmem %s24_s17, 256  ;;  %p949_p6 = scmp.lt.s32.totalorder %s24_s17, %s24_s17 }
  0x2e   :  { %p945_p5 = scmp.ne.s32.totalorder %s24_s17, %s944_s5  ;;  %p950_p7 = scmp.lt.s32.totalorder %s944_s5, %s944_s5 }
  0x30   :  { %p951_p8 = por %p950_p7, %p949_p6 }
  0x32   :  { %p952_p9 = pnand %p951_p8, %p945_p5 }
  0x34   :  { %955 = shalt.err (!%p952_p9)
}
  0x35   :  { %29 = dma.hbm_to_vmem [thread:$0]  %s1208_s0, 256, %s24_s17, [#allocation3], %s1032_s21, %s1032_s21, %s1033_s22  }
  0x36   :  { %s956_s13 = scalar_lea.hbm %s1211_s3, 2048 }
  0x37   :  { %p957_p10 = scmp.ne.s32.totalorder %s1211_s3, %s956_s13  ;;  %p960_p11 = scmp.lt.u32.totalorder %s956_s13, %s1211_s3 }
  0x39   :  { %p962_p12 = pnand %p960_p11, %p957_p10 }
  0x3b   :  { %965 = shalt.err (!%p962_p12)
}
  0x3c   :  { %s966_s16 = scalar_lea.vmem %s1125_s19, 2048  ;;  %p971_p0 = scmp.lt.s32.totalorder %s1125_s19, %s1125_s19 }
  0x3d   :  { %p967_p13 = scmp.ne.s32.totalorder %s1125_s19, %s966_s16  ;;  %p972_p1 = scmp.lt.s32.totalorder %s966_s16, %s966_s16 }
  0x3f   :  { %p973_p2 = por %p972_p1, %p971_p0 }
  0x41   :  { %p974_p3 = pnand %p973_p2, %p967_p13 }
  0x43   :  { %977 = shalt.err (!%p974_p3)
}
  0x44   :  { %55 = dma.hbm_to_vmem [thread:$0]  %s1211_s3, 2048, %s1125_s19, [#allocation6], %s1032_s21, %s1032_s21, %s1033_s22  }
  0x45   :  { %s1038_s18 = smov [#allocation10]   ;;  %s978_s25 = scalar_lea.hbm %s1215_s7, 4096 }
  0x46   :  { %s77_s20 = sshll.u32 %s1038_s18, 4  ;;  %p979_p4 = scmp.ne.s32.totalorder %s1215_s7, %s978_s25  ;;  %s78_s20 = int_to_ptr.vmem [resolvable:$true] %s77_s20 }
  0x47   :  { %p982_p5 = scmp.lt.u32.totalorder %s978_s25, %s1215_s7 }
  0x49   :  { %p984_p6 = pnand %p982_p5, %p979_p4 }
  0x4b   :  { %987 = shalt.err (!%p984_p6)
}
  0x4c   :  { %s988_s12 = scalar_lea.vmem %s78_s20, 4096  ;;  %p993_p8 = scmp.lt.s32.totalorder %s78_s20, %s78_s20 }
  0x4d   :  { %p989_p7 = scmp.ne.s32.totalorder %s78_s20, %s988_s12  ;;  %p994_p9 = scmp.lt.s32.totalorder %s988_s12, %s988_s12 }
  0x4f   :  { %p995_p10 = por %p994_p9, %p993_p8 }
  0x51   :  { %p996_p11 = pnand %p995_p10, %p989_p7 }
  0x53   :  { %999 = shalt.err (!%p996_p11)
}
  0x54   :  { %83 = dma.hbm_to_vmem [thread:$0]  %s1215_s7, 4096, %s78_s20, [#allocation9], %s1032_s21, %s1032_s21, %s1033_s22  }
  0x55   :  { %1022 = dma.done.wait [#allocation3], 256  }
  0x56   :  { %1023 = vsyncadd [#allocation3], 4294967040 }
  0x57   :  { %1024 = dma.done.wait [#allocation6], 4096  }
  0x58   :  { %1025 = vsyncadd [#allocation6], 4294963200 }
  0x59   :  { %1026 = dma.done.wait [#allocation9], 8192  }
  0x5a   :  { %1027 = vsyncadd [#allocation9], 4294959104  ;;  %v103_v0 = vld [vmem:[#allocation5] sm:$0xff]  ;;  %v104_v1 = vld [vmem:[#allocation5 + $0x8] sm:$0xff] }
  0x5b   :  { %v105_v2 = vld [vmem:[#allocation5 + $0x10] sm:$0xff]  ;;  %v743_v3 = vpack.c.bf16 %v104_v1, %v103_v0  ;;  %v106_v4 = vld [vmem:[#allocation5 + $0x18] sm:$0xff]  ;;  %v107_v6 = vld [vmem:[#allocation5 + $0x20] sm:$0xff] }
  0x5c   :  { %v747_v5 = vpack.c.bf16 %v106_v4, %v105_v2  ;;  %v108_v7 = vld [vmem:[#allocation5 + $0x28] sm:$0xff]  ;;  %v109_v9 = vld [vmem:[#allocation5 + $0x30] sm:$0xff]  ;;  %v110_v10 = vld [vmem:[#allocation5 + $0x38] sm:$0xff] }
  0x5d   :  { %744 = vmatprep.subr.bf16.mxu0 %v743_v3  ;;  %v751_v8 = vpack.c.bf16 %v108_v7, %v107_v6  ;;  %v101_v11 = vld [vmem:[#allocation2] sm:$0xff]  ;;  %v203_v12 = vld [vmem:[#allocation7] sm:$0xff]  ;;  %v204_v13 = vld [vmem:[#allocation7 + $0x8] sm:$0xff]  ;;  %v755_v20 = vpack.c.bf16 %v110_v10, %v109_v9 }
  0x5e   :  { %746 = vmatpush3.bf16.msra.mxu0 %v743_v3  ;;  %705 = vmatprep.mubr.f32.mxu0 %v101_v11  ;;  %v205_v14 = vld [vmem:[#allocation7 + $0x10] sm:$0xff]  ;;  %v775_v15 = vpack.c.bf16 %v204_v13, %v203_v12  ;;  %v206_v16 = vld [vmem:[#allocation7 + $0x18] sm:$0xff]  ;;  %v207_v18 = vld [vmem:[#allocation7 + $0x20] sm:$0xff] }
  0x5f   :  { %748 = vmatprep.subr.bf16.mxu0 %v747_v5  ;;  %v779_v17 = vpack.c.bf16 %v206_v16, %v205_v14  ;;  %v208_v19 = vld [vmem:[#allocation7 + $0x28] sm:$0xff]  ;;  %v111_v21 = vld [vmem:[#allocation5 + $0x40] sm:$0xff]  ;;  %v209_v24 = vld [vmem:[#allocation7 + $0x30] sm:$0xff] }
  0x60   :  { %776 = vmatprep.subr.bf16.mxu1 %v775_v15  ;;  %v112_v22 = vld [vmem:[#allocation5 + $0x48] sm:$0xff]  ;;  %v783_v23 = vpack.c.bf16 %v208_v19, %v207_v18  ;;  %v210_v25 = vld [vmem:[#allocation7 + $0x38] sm:$0xff]  ;;  %v113_v27 = vld [vmem:[#allocation5 + $0x50] sm:$0xff] }
  0x61   :  { %778 = vmatpush3.bf16.msra.mxu1 %v775_v15  ;;  %v759_v26 = vpack.c.bf16 %v112_v22, %v111_v21  ;;  %v114_v28 = vld [vmem:[#allocation5 + $0x58] sm:$0xff]  ;;  %v787_v29 = vpack.c.bf16 %v210_v25, %v209_v24  ;;  %v211_v30 = vld [vmem:[#allocation7 + $0x40] sm:$0xff]  ;;  %v212_v31 = vld [vmem:[#allocation7 + $0x48] sm:$0xff] }
  0x62   :  { %750 = vmatpush3.bf16.msra.mxu0 %v747_v5  ;;  %780 = vmatprep.subr.bf16.mxu1 %v779_v17  ;;  %v763_v32 = vpack.c.bf16 %v114_v28, %v113_v27  ;;  %v115_v33 = vld [vmem:[#allocation5 + $0x60] sm:$0xff]  ;;  %v116_v34 = vld [vmem:[#allocation5 + $0x68] sm:$0xff]  ;;  %v791_v35 = vpack.c.bf16 %v212_v31, %v211_v30  ;;  %v213_v36 = vld [vmem:[#allocation7 + $0x50] sm:$0xff] }
  0x63   :  { %752 = vmatprep.subr.bf16.mxu0 %v751_v8  ;;  %v214_v37 = vld [vmem:[#allocation7 + $0x58] sm:$0xff]  ;;  %v767_v38 = vpack.c.bf16 %v116_v34, %v115_v33  ;;  %v117_v39 = vld [vmem:[#allocation5 + $0x70] sm:$0xff]  ;;  %v215_v42 = vld [vmem:[#allocation7 + $0x60] sm:$0xff] }
  0x64   :  { %v118_v40 = vld [vmem:[#allocation5 + $0x78] sm:$0xff]  ;;  %v795_v41 = vpack.c.bf16 %v214_v37, %v213_v36  ;;  %v216_v43 = vld [vmem:[#allocation7 + $0x68] sm:$0xff]  ;;  %v217_v47 = vld [vmem:[#allocation7 + $0x70] sm:$0xff] }
  0x65   :  { %782 = vmatpush3.bf16.msra.mxu1 %v779_v17  ;;  %v771_v44 = vpack.c.bf16 %v118_v40, %v117_v39  ;;  %v799_v45 = vpack.c.bf16 %v216_v43, %v215_v42  ;;  %v102_v46 = vld [vmem:[#allocation2 + $0x8] sm:$0xff]  ;;  %v304_v50 = vld [vmem:[#allocation8 + $0x8] sm:$0xff]  ;;  %v303_v52 = vld [vmem:[#allocation8] sm:$0xff] }
  0x66   :  { %754 = vmatpush3.bf16.msra.mxu0 %v751_v8  ;;  %784 = vmatprep.subr.bf16.mxu1 %v783_v23  ;;  %v218_v48 = vld [vmem:[#allocation7 + $0x78] sm:$0xff]  ;;  %v305_v54 = vld [vmem:[#allocation8 + $0x10] sm:$0xff]  ;;  %v308_v55 = vld [vmem:[#allocation8 + $0x28] sm:$0xff] }
  0x67   :  { %756 = vmatprep.subr.bf16.mxu0 %v755_v20  ;;  %v803_v49 = vpack.c.bf16 %v218_v48, %v217_v47  ;;  %v306_v51 = vld [vmem:[#allocation8 + $0x18] sm:$0xff]  ;;  %v809_v57 = vpack.c.bf16 %v305_v54, %v303_v52  ;;  %v307_v59 = vld [vmem:[#allocation8 + $0x20] sm:$0xff]  ;;  %v309_v60 = vld [vmem:[#allocation8 + $0x30] sm:$0xff] }
  0x68   :  { %v807_v53 = vpack.c.bf16 %v306_v51, %v304_v50  ;;  %v310_v56 = vld [vmem:[#allocation8 + $0x38] sm:$0xff]  ;;  %v312_v61 = vld [vmem:[#allocation8 + $0x48] sm:$0xff]  ;;  %v813_v63 = vpack.c.bf16 %v309_v60, %v307_v59  ;;  %v311_v1 = vld [vmem:[#allocation8 + $0x40] sm:$0xff] }
  0x69   :  { %786 = vmatpush3.bf16.msra.mxu1 %v783_v23  ;;  %v811_v58 = vpack.c.bf16 %v310_v56, %v308_v55  ;;  %v314_v62 = vld [vmem:[#allocation8 + $0x58] sm:$0xff]  ;;  %v313_v2 = vld [vmem:[#allocation8 + $0x50] sm:$0xff]  ;;  %v316_v3 = vld [vmem:[#allocation8 + $0x68] sm:$0xff] }
  0x6a   :  { %758 = vmatpush3.bf16.msra.mxu0 %v755_v20  ;;  %788 = vmatprep.subr.bf16.mxu1 %v787_v29  ;;  %v815_v0 = vpack.c.bf16 %v314_v62, %v312_v61  ;;  %v318_v4 = vld [vmem:[#allocation8 + $0x78] sm:$0xff]  ;;  %v817_v5 = vpack.c.bf16 %v313_v2, %v311_v1  ;;  %v315_v7 = vld [vmem:[#allocation8 + $0x60] sm:$0xff]  ;;  %v317_v8 = vld [vmem:[#allocation8 + $0x70] sm:$0xff] }
  0x6b   :  { %760 = vmatprep.subr.bf16.mxu0 %v759_v26  ;;  %v819_v6 = vpack.c.bf16 %v318_v4, %v316_v3  ;;  %v320_v9 = vld [vmem:[#allocation8 + $0x88] sm:$0xff]  ;;  %v322_v10 = vld [vmem:[#allocation8 + $0x98] sm:$0xff]  ;;  %v821_v11 = vpack.c.bf16 %v317_v8, %v315_v7  ;;  %v319_v13 = vld [vmem:[#allocation8 + $0x80] sm:$0xff] }
  0x6c   :  { %v823_v12 = vpack.c.bf16 %v322_v10, %v320_v9  ;;  %v321_v14 = vld [vmem:[#allocation8 + $0x90] sm:$0xff]  ;;  %v324_v15 = vld [vmem:[#allocation8 + $0xa8] sm:$0xff]  ;;  %v326_v16 = vld [vmem:[#allocation8 + $0xb8] sm:$0xff] }
  0x6d   :  { %790 = vmatpush3.bf16.msra.mxu1 %v787_v29  ;;  %v825_v17 = vpack.c.bf16 %v321_v14, %v319_v13  ;;  %v827_v18 = vpack.c.bf16 %v326_v16, %v324_v15  ;;  %v323_v19 = vld [vmem:[#allocation8 + $0xa0] sm:$0xff]  ;;  %v325_v20 = vld [vmem:[#allocation8 + $0xb0] sm:$0xff]  ;;  %v328_v21 = vld [vmem:[#allocation8 + $0xc8] sm:$0xff] }
  0x6e   :  { %762 = vmatpush3.bf16.msra.mxu0 %v759_v26  ;;  %792 = vmatprep.subr.bf16.mxu1 %v791_v35  ;;  %v330_v22 = vld [vmem:[#allocation8 + $0xd8] sm:$0xff]  ;;  %v829_v23 = vpack.c.bf16 %v325_v20, %v323_v19  ;;  %v327_v25 = vld [vmem:[#allocation8 + $0xc0] sm:$0xff]  ;;  %v329_v26 = vld [vmem:[#allocation8 + $0xd0] sm:$0xff] }
  0x6f   :  { %764 = vmatprep.subr.bf16.mxu0 %v763_v32  ;;  %v831_v24 = vpack.c.bf16 %v330_v22, %v328_v21  ;;  %v833_v27 = vpack.c.bf16 %v329_v26, %v327_v25  ;;  %v596_v28 = vld [vmem:[%s1210_s2] ss:$0 sm:$0xff]  ;;  %v334_v36 = vld [vmem:[#allocation8 + $0xf8] sm:$0xff]  ;;  %v444_v42 = vld [vmem:[#allocation10 + $0x80] sm:$0xff] }
  0x70   :  { %v333_v39 = vld [vmem:[#allocation8 + $0xf0] sm:$0xff]  ;;  %v445_v43 = vld [vmem:[#allocation10 + $0x88] sm:$0xff]  ;;  %v447_v48 = vld [vmem:[#allocation10 + $0x98] sm:$0xff] }
  0x71   :  { %794 = vmatpush3.bf16.msra.mxu1 %v791_v35  ;;  %v332_v35 = vld [vmem:[#allocation8 + $0xe8] sm:$0xff]  ;;  %v446_v47 = vld [vmem:[#allocation10 + $0x90] sm:$0xff]  ;;  %v431_v52 = vld [vmem:[#allocation10 + $0x18] sm:$0xff] }
  0x72   :  { %766 = vmatpush3.bf16.msra.mxu0 %v763_v32  ;;  %796 = vmatprep.subr.bf16.mxu1 %v795_v41  ;;  %v835_v37 = vpack.c.bf16 %v334_v36, %v332_v35  ;;  %v843_v50 = vpack.c.bf16 %v447_v48, %v446_v47  ;;  %v430_v51 = vld [vmem:[#allocation10 + $0x10] sm:$0xff]  ;;  %v449_v54 = vld [vmem:[#allocation10 + $0xa8] sm:$0xff]  ;;  %v451_v60 = vld [vmem:[#allocation10 + $0xb8] sm:$0xff] }
  0x73   :  { %768 = vmatprep.subr.bf16.mxu0 %v767_v38  ;;  %v845_v55 = vpack.c.bf16 %v431_v52, %v430_v51  ;;  %v450_v59 = vld [vmem:[#allocation10 + $0xb0] sm:$0xff]  ;;  %v452_v1 = vld [vmem:[#allocation10 + $0xc0] sm:$0xff]  ;;  %v453_v2 = vld [vmem:[#allocation10 + $0xc8] sm:$0xff] }
  0x74   :  { %v851_v62 = vpack.c.bf16 %v451_v60, %v450_v59  ;;  %v855_v4 = vpack.c.bf16 %v453_v2, %v452_v1  ;;  %v454_v7 = vld [vmem:[#allocation10 + $0xd0] sm:$0xff]  ;;  %v455_v8 = vld [vmem:[#allocation10 + $0xd8] sm:$0xff]  ;;  %v456_v13 = vld [vmem:[#allocation10 + $0xe0] sm:$0xff] }
  0x75   :  { %798 = vmatpush3.bf16.msra.mxu1 %v795_v41  ;;  %v1039_v41 = vmov 0.0   ;;  %v859_v10 = vpack.c.bf16 %v455_v8, %v454_v7  ;;  %v457_v14 = vld [vmem:[#allocation10 + $0xe8] sm:$0xff]  ;;  %v335_v36 = vld [vmem:[%s1214_s6] sm:$0x3] }
  0x76   :  { %770 = vmatpush3.bf16.msra.mxu0 %v767_v38  ;;  %800 = vmatprep.subr.bf16.mxu1 %v799_v45  ;;  %v331_v38 = vld [vmem:[#allocation8 + $0xe0] sm:$0xff]  ;;  %v863_v16 = vpack.c.bf16 %v457_v14, %v456_v13  ;;  %v441_v25 = vld [vmem:[#allocation10 + $0x68] sm:$0xff] }
  0x77   :  { %772 = vmatprep.subr.bf16.mxu0 %v771_v44  ;;  %v837_v40 = vpack.c.bf16 %v333_v39, %v331_v38 }
  0x79   :  { %802 = vmatpush3.bf16.msra.mxu1 %v799_v45  ;;  %v839_v45 = vpack.c.bf16 %v445_v43, %v444_v42 }
  0x7a   :  { %774 = vmatpush3.bf16.msra.mxu0 %v771_v44  ;;  %804 = vmatprep.subr.bf16.mxu1 %v803_v49  ;;  %v428_v44 = vld [vmem:[#allocation10] sm:$0xff] }
  0x7b   :  { %808 = vmatprep.subr.bf16.mxu0 %v807_v53  ;;  %v448_v53 = vld [vmem:[#allocation10 + $0xa0] sm:$0xff] }
  0x7c   :  { %v847_v56 = vpack.c.bf16 %v449_v54, %v448_v53  ;;  %v598_v54 = vld [vmem:[%s1216_s8] ss:$0 sm:$0xff]  ;;  %s1040_s8 = smov [#allocation11]  }
  0x7d   :  { %706 = vmatmul.mubr.f32.vlgmr.msra.gmra.mrb[0].mxu0 %v102_v46  ;;  %806 = vmatpush3.bf16.msra.mxu1 %v803_v49  ;;  %v429_v46 = vld [vmem:[#allocation10 + $0x8] sm:$0xff]  ;;  %s582_s1 = sshll.u32 %s1040_s8, 4  ;;  %s583_s1 = int_to_ptr.vmem [resolvable:$true] %s582_s1 }
  0x7e   :  { %810 = vmatpush1.bf16.msra.mxu0 %v809_v57  ;;  %411 = vmatprep.mubr.f32.mxu0 %v1039_v41  ;;  %v841_v49 = vpack.c.bf16 %v429_v46, %v428_v44  ;;  %v432_v57 = vld [vmem:[#allocation10 + $0x20] sm:$0xff]  ;;  %s1000_s10 = scalar_lea.vmem %s583_s1, 256  ;;  %p1005_p13 = scmp.lt.s32.totalorder %s583_s1, %s583_s1 }
  0x7f   :  { %812 = vmatprep.subr.bf16.mxu0 %v811_v58  ;;  %840 = vmatprep.subr.bf16.mxu1 %v839_v45  ;;  %v433_v58 = vld [vmem:[#allocation10 + $0x28] sm:$0xff]  ;;  %p1001_p12 = scmp.ne.s32.totalorder %s583_s1, %s1000_s10  ;;  %p1006_p0 = scmp.lt.s32.totalorder %s1000_s10, %s1000_s10 }
  0x80   :  { %v849_v61 = vpack.c.bf16 %v433_v58, %v432_v57 }
  0x81   :  { %p1007_p1 = por %p1006_p0, %p1005_p13 }
  0x82   :  { %814 = vmatpush1.bf16.msra.mxu0 %v813_v63  ;;  %v434_v63 = vld [vmem:[#allocation10 + $0x30] sm:$0xff] }
  0x83   :  { %816 = vmatprep.subr.bf16.mxu0 %v815_v0  ;;  %v435_v0 = vld [vmem:[#allocation10 + $0x38] sm:$0xff]  ;;  %p1008_p2 = pnand %p1007_p1, %p1001_p12 }
  0x84   :  { %v853_v3 = vpack.c.bf16 %v435_v0, %v434_v63 }
  0x86   :  { %818 = vmatpush1.bf16.msra.mxu0 %v817_v5  ;;  %v436_v5 = vld [vmem:[#allocation10 + $0x40] sm:$0xff] }
  0x87   :  { %820 = vmatprep.subr.bf16.mxu0 %v819_v6  ;;  %v437_v6 = vld [vmem:[#allocation10 + $0x48] sm:$0xff] }
  0x88   :  { %v857_v9 = vpack.c.bf16 %v437_v6, %v436_v5 }
  0x8a   :  { %822 = vmatpush1.bf16.msra.mxu0 %v821_v11  ;;  %v438_v11 = vld [vmem:[#allocation10 + $0x50] sm:$0xff] }
  0x8b   :  { %824 = vmatprep.subr.bf16.mxu0 %v823_v12  ;;  %v439_v12 = vld [vmem:[#allocation10 + $0x58] sm:$0xff] }
  0x8c   :  { %v861_v15 = vpack.c.bf16 %v439_v12, %v438_v11 }
  0x8e   :  { %826 = vmatpush1.bf16.msra.mxu0 %v825_v17  ;;  %v597_v17 = vld [vmem:[%s1212_s4] ss:$0 sm:$0xff] }
  0x8f   :  { %828 = vmatprep.subr.bf16.mxu0 %v827_v18 }
  0x92   :  { %830 = vmatpush1.bf16.msra.mxu0 %v829_v23 }
  0x93   :  { %832 = vmatprep.subr.bf16.mxu0 %v831_v24  ;;  %v440_v24 = vld [vmem:[#allocation10 + $0x60] sm:$0xff] }
  0x94   :  { %v865_v26 = vpack.c.bf16 %v441_v25, %v440_v24 }
  0x96   :  { %834 = vmatpush1.bf16.msra.mxu0 %v833_v27  ;;  %v458_v27 = vld [vmem:[#allocation10 + $0xf0] sm:$0xff] }
  0x97   :  { %836 = vmatprep.subr.bf16.mxu0 %v835_v37 }
  0x9a   :  { %838 = vmatpush1.bf16.msra.mxu0 %v837_v40 }
 0x150   :  { %v707_v29 = vpop.f32.mrb[0].mxu0 }
 0x151   :  { %v198_v30 = vadd.f32 %v707_v29, %v596_v28  ;;  %v192_v31 = vpop.f32.mrb[1].mxu0 }
 0x152   :  { %v193_v32 = vadd.f32 %v596_v28, %v192_v31  ;;  %v459_v28 = vld [vmem:[#allocation10 + $0xf8] sm:$0xff] }
 0x153   :  { %v202_v34 = vmax.f32 %v198_v30, 0.0  ;;  %v867_v29 = vpack.c.bf16 %v459_v28, %v458_v27  ;;  %v442_v30 = vld [vmem:[#allocation10 + $0x70] sm:$0xff]  ;;  %v443_v31 = vld [vmem:[#allocation10 + $0x78] sm:$0xff] }
 0x154   :  { %v201_v33 = vmax.f32 %v193_v32, 0.0  ;;  %v869_v32 = vpack.c.bf16 %v443_v31, %v442_v30 }
 0x156   :  { %740 = vmatprep.mubr.f32.mxu1 %v201_v33  ;;  %v337_v33 = vlaneseq }
 0x157   :  { %741 = vmatmul.mubr.f32.vlgmr.msra.gmra.mrb[0].mxu1 %v202_v34 }
 0x158   :  { %842 = vmatpush3.bf16.msra.mxu1 %v841_v49  ;;  %v338_v34 = vshrl.u32 %v337_v33, 7  ;;  %v543_v52 = vand.u32 127, %v337_v33 }
 0x159   :  { %844 = vmatprep.subr.bf16.mxu1 %v843_v50 }
 0x15a   :  { %v339_v35 = vsub.s32 0, %v338_v34  ;;  %v343_v37 = vsub.s32 1, %v338_v34  ;;  %vm544_vm0 = vcmp.lt.s32.totalorder %v543_v52, 16 }
 0x15c   :  { %846 = vmatpush3.bf16.msra.mxu1 %v845_v55  ;;  %v340_v38 = vrot.slane %v335_v36, %v339_v35  ;;  %v344_v39 = vrot.slane %v335_v36, %v343_v37 }
 0x15d   :  { %848 = vmatprep.subr.bf16.mxu1 %v847_v56 }
 0x160   :  { %850 = vmatpush3.bf16.msra.mxu1 %v849_v61 }
 0x161   :  { %852 = vmatprep.subr.bf16.mxu1 %v851_v62 }
 0x164   :  { %854 = vmatpush3.bf16.msra.mxu1 %v853_v3 }
 0x165   :  { %856 = vmatprep.subr.bf16.mxu1 %v855_v4 }
 0x168   :  { %858 = vmatpush3.bf16.msra.mxu1 %v857_v9 }
 0x169   :  { %860 = vmatprep.subr.bf16.mxu1 %v859_v10 }
 0x16c   :  { %862 = vmatpush3.bf16.msra.mxu1 %v861_v15 }
 0x16d   :  { %864 = vmatprep.subr.bf16.mxu1 %v863_v16 }
 0x170   :  { %866 = vmatpush3.bf16.msra.mxu1 %v865_v26 }
 0x171   :  { %868 = vmatprep.subr.bf16.mxu1 %v867_v29 }
 0x174   :  { %870 = vmatpush3.bf16.msra.mxu1 %v869_v32 }
 0x22a   :  { %v742_v18 = vpop.f32.mrb[0].mxu1 }
 0x22b   :  { %v292_v19 = vpop.f32.mrb[1].mxu1  ;;  %v298_v21 = vadd.f32 %v742_v18, %v597_v17 }
 0x22c   :  { %v293_v20 = vadd.f32 %v597_v17, %v292_v19 }
 0x22d   :  { %v302_v23 = vmax.f32 %v298_v21, 0.0 }
 0x22e   :  { %v301_v22 = vmax.f32 %v293_v20, 0.0 }
 0x230   :  { %412 = vmatmul.mubr.f32.vlgmr.msra.gmra.mrb[2].mxu0 %v301_v22 }
 0x231   :  { %417 = vmatprep.mubr.f32.mxu0 %v1039_v41 }
 0x234   :  { %418 = vmatmul.mubr.f32.gmra.mrb[4].mxu0 %v302_v23 }
 0x303   :  { %v413_v40 = vpop.f32.mrb[2].mxu0 }
 0x304   :  { %v414_v41 = vadd.f32 %v413_v40, %v340_v38  ;;  %v415_v42 = vpop.f32.mrb[3].mxu0 }
 0x305   :  { %v416_v43 = vadd.f32 %v415_v42, %v344_v39 }
 0x306   :  { %v424_v46 = vmax.f32 %v414_v41, 0.0 }
 0x307   :  { %v425_v44 = vmax.f32 %v416_v43, 0.0  ;;  %v419_v45 = vpop.f32.mrb[4].mxu0 }
 0x308   :  { %v420_v47 = vadd.f32 %v419_v45, %v340_v38  ;;  %v421_v48 = vpop.f32.mrb[5].mxu0 }
 0x309   :  { %v422_v49 = vadd.f32 %v421_v48, %v344_v39  ;;  %531 = vmatprep.mubr.f32.mxu1 %v425_v44 }
 0x30a   :  { %532 = vmatmul.mubr.f32.vlgmr.msra.gmra.mrb[2].mxu1 %v424_v46  ;;  %v426_v51 = vmax.f32 %v420_v47, 0.0 }
 0x30b   :  { %v427_v50 = vmax.f32 %v422_v49, 0.0 }
 0x30d   :  { %536 = vmatprep.mubr.f32.mxu1 %v427_v50 }
 0x30e   :  { %537 = vmatmul.mubr.f32.gmra.mrb[4].mxu1 %v426_v51 }
 0x3dd   :  { %v667_v53 = vpop.f32.mrb[2].mxu1 }
 0x3de   :  { %v668_v55 = vpop.f32.mrb[3].mxu1 }
 0x3df   :  { %v669_v56 = vadd.f32 %v668_v55, %v667_v53 }
 0x3e1   :  { %v534_v57 = vadd.f32 %v669_v56, %v598_v54  ;;  %v670_v58 = vpop.f32.mrb[4].mxu1 }
 0x3e2   :  { %v671_v59 = vpop.f32.mrb[5].mxu1 }
 0x3e3   :  { %v672_v60 = vadd.f32 %v671_v59, %v670_v58  ;;  %v545_v61 = vsel %vm544_vm0, %v534_v57, -inf }
 0x3e4   :  { %547 = vmax.xlane.f32.xlu0 %v545_v61 }
 0x3e5   :  { %v539_v62 = vadd.f32 %v672_v60, %v598_v54 }
 0x3e7   :  { %v546_v63 = vsel %vm544_vm0, %v539_v62, -inf }
 0x3e8   :  { %549 = vmax.xlane.f32.xlu0 %v546_v63 }
 0x471   :  { %v548_v0 = vpop.xlane.xlu0 %547 }
 0x472   :  { %v551_v1 = vsub.f32 %v545_v61, %v548_v0 }
 0x474   :  { %v553_v2 = vmul.f32 1.442695, %v551_v1 }
 0x475   :  { %v550_v3 = vpop.xlane.xlu0 %549 }
 0x476   :  { %v552_v4 = vsub.f32 %v546_v63, %v550_v3  ;;  %882 = vpow2.f32 %v553_v2 }
 0x478   :  { %v555_v5 = vmul.f32 1.442695, %v552_v4 }
 0x47a   :  { %884 = vpow2.f32 %v555_v5 }
 0x480   :  { %v883_v6 = vpop.eup %882 }
 0x481   :  { %557 = vadd.xlane.f32.xlu1 %v883_v6 }
 0x484   :  { %v885_v7 = vpop.eup %884 }
 0x485   :  { %559 = vadd.xlane.f32.xlu1 %v885_v7 }
 0x50e   :  { %v558_v8 = vpop.xlane.xlu1 %557 }
 0x50f   :  { %886 = vlog2.f32 %v558_v8 }
 0x512   :  { %v560_v9 = vpop.xlane.xlu1 %559 }
 0x513   :  { %888 = vlog2.f32 %v560_v9 }
 0x519   :  { %v887_v10 = vpop.eup %886 }
 0x51a   :  { %v562_v11 = vmul.f32 0.6931472, %v887_v10 }
 0x51c   :  { %v565_v12 = vadd.f32 %v562_v11, %v548_v0 }
 0x51d   :  { %v889_v13 = vpop.eup %888 }
 0x51e   :  { %v567_v14 = vsub.f32 %v534_v57, %v565_v12  ;;  %v564_v15 = vmul.f32 0.6931472, %v889_v13 }
 0x520   :  { %v569_v16 = vmax.f32 %v567_v14, -15.0  ;;  %v566_v17 = vadd.f32 %v564_v15, %v550_v3 }
 0x522   :  { %v571_v18 = vmin.f32 %v569_v16, 0.0  ;;  %v568_v19 = vsub.f32 %v539_v62, %v566_v17 }
 0x524   :  { %v570_v20 = vmax.f32 %v568_v19, -15.0  ;;  %v573_v21 = vsel %vm544_vm0, %v571_v18, %v534_v57 }
 0x525   :  { %575 = vst [vmem:[#allocation11] sm:$0xff] %v573_v21 }
 0x526   :  { %v572_v22 = vmin.f32 %v570_v20, 0.0 }
 0x528   :  { %v574_v23 = vsel %vm544_vm0, %v572_v22, %v539_v62 }
 0x529   :  { %576 = vst [vmem:[#allocation11 + $0x8] sm:$0xff] %v574_v23 }
 0x52a   :  { %1011 = shalt.err (!%p1008_p2)
}
 0x52b   :  { %s1012_s16 = scalar_lea.hbm %s1217_s9, 256 }
 0x52c   :  { %p1013_p3 = scmp.ne.s32.totalorder %s1217_s9, %s1012_s16  ;;  %p1016_p4 = scmp.lt.u32.totalorder %s1012_s16, %s1217_s9 }
 0x52e   :  { %p1018_p5 = pnand %p1016_p4, %p1013_p3 }
 0x530   :  { %1021 = shalt.err (!%p1018_p5)
}
 0x531   :  { %588 = dma.vmem_to_hbm [thread:$0]  %s583_s1, 256, %s1217_s9, [#allocation4], %s1032_s21, %s1032_s21, %s1033_s22  }
 0x532   :  { %1028 = dma.done.wait [#allocation4], 256  }
 0x533   :  { %1029 = vsyncadd [#allocation4], 4294967040 }
 0x534   :  { %592 = vsyncpa [#allocation3], 1 }
 0x535   :  { %593 = vsyncpa [#allocation6], 1 }
 0x536   :  { %594 = vsyncpa [#allocation9], 1 }
 0x537   :  { %595 = vsyncpa [#allocation4], 1 }

</bundles_post_ra>
